<compile_context>
chip_gen: v7x
topology: tpu7x:2x2x1
jax: 0.10.0
libtpu: 0.0.40
codegen_flags: <defaults>
</compile_context>

<pallas_src>
import functools

import jax
import jax.numpy as jnp
from jax.experimental import pallas as pl
from jax.experimental.pallas import tpu as pltpu

MARGIN = 0.2
SCALE = 1.0

_MiB = 1024 * 1024
_LANE = 128


# ----------------------------------------------------------------------------
# generation-aware VMEM budgets and tile-size helpers
# ----------------------------------------------------------------------------
def _vmem_budget():
    """(working-set budget for tiled blocks, vmem_limit_bytes cap)."""
    try:
        phys = int(pltpu.get_tpu_info().vmem_capacity_bytes)
    except Exception:
        phys = 64 * _MiB            # conservative fallback: assume v7x-sized VMEM
    if phys >= 96 * _MiB:           # v5e / v6e: 128 MiB physical per TensorCore
        return 56 * _MiB, 96 * _MiB
    return 24 * _MiB, 48 * _MiB     # v7x: 64 MiB physical, leave headroom


def _lane_pad(n):
    return ((n + _LANE - 1) // _LANE) * _LANE


def _sublane_tile(dim, requested, *, min_multiple=8, max_rows=None):
    """Largest power-of-two tile <= requested that divides `dim`, is a
    multiple of `min_multiple`, and (optionally) stays under `max_rows`."""
    cap = min(requested, dim)
    if max_rows is not None:
        cap = min(cap, max_rows)
    t, best = min_multiple, None
    while t <= cap:
        if dim % t == 0:
            best = t
        t *= 2
    return best if best is not None else dim   # awkward dim -> one full block


def _lane_tile(dim, requested):
    cap = min(requested, dim)
    t, best = _LANE, None
    while t <= cap:
        if dim % t == 0:
            best = t
        t *= 2
    return best if best is not None else dim   # full extent (always legal)


def _ensure_min_tiles(dim, tile, *, min_multiple=8, min_tiles=2):
    """Halve `tile` until the axis has >= min_tiles grid steps (keeps both
    v7x TensorCores busy on a 'parallel' axis); no-op if it can't divide."""
    while (dim // tile < min_tiles and tile % 2 == 0
           and tile // 2 >= min_multiple and dim % (tile // 2) == 0):
        tile //= 2
    return tile


def _min_sublane_mult(*dtypes):
    return 16 if any(jnp.dtype(d).itemsize < 4 for d in dtypes) else 8


# ----------------------------------------------------------------------------
# Kernel 1: ModelLMCLFixed.forward  (L2-normalise rows, cosine matmul on MXU)
# ----------------------------------------------------------------------------
def _cosine_logits_kernel(emb_ref, cent_ref, out_ref, en_ref):
    # Normalise the emb tile once per batch tile (j == 0) and reuse it across
    # all class tiles: the row norm (XLU reduce + EUP rsqrt) is not recomputed.
    @pl.when(pl.program_id(1) == 0)
    def _():
        e = emb_ref[...].astype(jnp.float32)
        inv_norm = jax.lax.rsqrt(jnp.sum(e * e, axis=-1, keepdims=True))
        en_ref[...] = (e * inv_norm).astype(en_ref.dtype)

    en = en_ref[...]                                               # (TM, D)
    c = cent_ref[...].astype(en.dtype)                             # (TN, D)
    out = jax.lax.dot_general(en, c, (((1,), (1,)), ((), ())),
                              preferred_element_type=jnp.float32)
    out_ref[...] = out.astype(out_ref.dtype)


def lmcl_fixed_forward(emb, centroids, *, tile_m=512, tile_n=512,
                       mxu_dtype=None):
    """emb: [B, D], centroids: [C, D] (already L2-normalised, as in __init__).
    Returns (emb, cosine_logits[B, C]) matching the PyTorch forward."""
    B, D = emb.shape
    C, D2 = centroids.shape
    assert D == D2, "embedding / centroid hidden dims must match"

    if mxu_dtype is not None:                   # halve centroid HBM traffic too
        centroids = centroids.astype(mxu_dtype)
    en_dtype = mxu_dtype if mxu_dtype is not None else jnp.float32

    e_item = jnp.dtype(emb.dtype).itemsize
    c_item = jnp.dtype(centroids.dtype).itemsize
    o_item = jnp.dtype(emb.dtype).itemsize
    Dp = _lane_pad(D)
    work_budget, vmem_cap = _vmem_budget()

    tn = _lane_tile(C, tile_n)
    # Per-row (of tm) VMEM cost: emb blocks (x2), output blocks (x2), en scratch.
    per_row = 2 * Dp * e_item + 2 * _lane_pad(tn) * o_item + Dp * 4
    fixed = 2 * tn * Dp * c_item                # centroid blocks (x2)
    max_rows = max(8, (work_budget - fixed) // per_row)
    min_mult = _min_sublane_mult(emb.dtype, en_dtype)
    tm = _sublane_tile(B, tile_m, min_multiple=min_mult, max_rows=max_rows)
    tm = _ensure_min_tiles(B, tm, min_multiple=min_mult)   # keep both v7x TCs busy

    need = fixed + tm * per_row
    vmem_limit = int(min(vmem_cap, max(32 * _MiB, need + 16 * _MiB)))

    out = pl.pallas_call(
        _cosine_logits_kernel,
        out_shape=jax.ShapeDtypeStruct((B, C), emb.dtype),
        grid_spec=pltpu.PrefetchScalarGridSpec(
            num_scalar_prefetch=0,
            grid=(B // tm, C // tn),
            in_specs=[
                pl.BlockSpec((tm, D), lambda i, j: (i, 0)),
                pl.BlockSpec((tn, D), lambda i, j: (j, 0)),
            ],
            out_specs=pl.BlockSpec((tm, tn), lambda i, j: (i, j)),
            scratch_shapes=[pltpu.VMEM((tm, D), en_dtype)],
        ),
        compiler_params=pltpu.CompilerParams(
            # j must stay sequential per i so the j==0 scratch init is valid.
            dimension_semantics=("parallel", "arbitrary"),
            vmem_limit_bytes=vmem_limit),
    )(emb, centroids)
    return emb, out


# ----------------------------------------------------------------------------
# Kernel 2 (train path): FUSED normalise + cosine matmul + CosFace margin CE.
# Online logsumexp over class tiles -> the (B, C) logits never touch HBM.
# ----------------------------------------------------------------------------
def _fused_lmcl_loss_kernel(emb_ref, cent_ref, labels_ref, out_ref,
                            en_ref, m_ref, l_ref, tgt_ref, *,
                            margin, scale, tile_n):
    j = pl.program_id(1)

    @pl.when(j == 0)
    def _():
        e = emb_ref[...].astype(jnp.float32)
        inv_norm = jax.lax.rsqrt(jnp.sum(e * e, axis=-1, keepdims=True))
        en_ref[...] = (e * inv_norm).astype(en_ref.dtype)
        m_ref[...] = jnp.full_like(m_ref, -jnp.inf)
        l_ref[...] = jnp.zeros_like(l_ref)
        tgt_ref[...] = jnp.zeros_like(tgt_ref)

    en = en_ref[...]                                               # (TB, D)
    c = cent_ref[...].astype(en.dtype)                             # (TN, D)
    s = jax.lax.dot_general(en, c, (((1,), (1,)), ((), ())),
                            preferred_element_type=jnp.float32)    # (TB, TN)

    labels = labels_ref[...]                                       # (TB, 1)
    col = j * tile_n + jax.lax.broadcasted_iota(jnp.int32, s.shape, 1)
    match = col == labels

    # CosFace margin at the target class; scale elided at trace time if == 1.
    s = jnp.where(match, s - margin, s)
    if scale != 1.0:
        s = s * scale

    # Online (streaming) logsumexp over the class tiles.
    m_prev = m_ref[...]
    m_new = jnp.maximum(m_prev, jnp.max(s, axis=-1, keepdims=True))
    alpha = jnp.exp(m_prev - m_new)
    l_ref[...] = alpha * l_ref[...] + jnp.sum(jnp.exp(s - m_new), axis=-1,
                                              keepdims=True)
    m_ref[...] = m_new
    # Target logit lives in exactly one class tile.
    tgt_ref[...] += jnp.sum(jnp.where(match, s, 0.0), axis=-1, keepdims=True)

    @pl.when(j == pl.num_programs(1) - 1)
    def _():
        out_ref[...] = m_ref[...] + jnp.log(l_ref[...]) - tgt_ref[...]


def lmcl_fixed_train_loss(emb, centroids, labels, *, margin=MARGIN,
                          scale=SCALE, tile_b=None, tile_n=None,
                          mxu_dtype=None):
    """Fused forward + LMCL (CosFace) mean CE loss. emb: [B, D],
    centroids: [C, D] (L2-normalised), labels: [B] int. Returns f32 scalar."""
    B, D = emb.shape
    C, D2 = centroids.shape
    assert D == D2, "embedding / centroid hidden dims must match"
    assert labels.shape == (B,)

    if mxu_dtype is not None:
        centroids = centroids.astype(mxu_dtype)
    en_dtype = mxu_dtype if mxu_dtype is not None else jnp.float32

    e_item = jnp.dtype(emb.dtype).itemsize
    c_item = jnp.dtype(centroids.dtype).itemsize
    Dp = _lane_pad(D)
    work_budget, vmem_cap = _vmem_budget()

    tn = _lane_tile(C, 2048 if tile_n is None else tile_n)
    # Per-row cost: emb (x2), labels (x2, lane-padded to 128), out (x2,
    # lane-padded), en scratch, m/l/tgt scratches (lane-padded).
    per_row = (2 * Dp * e_item + 2 * _LANE * 4 + 2 * _LANE * 4
               + Dp * 4 + 3 * _LANE * 4)
    fixed = 2 * tn * Dp * c_item
    max_rows = max(8, (work_budget - fixed) // per_row)
    min_mult = _min_sublane_mult(emb.dtype, en_dtype)
    req = B if tile_b is None else tile_b
    tb = _sublane_tile(B, req, min_multiple=min_mult, max_rows=max_rows)
    tb = _ensure_min_tiles(B, tb, min_multiple=min_mult)
    assert B % tb == 0 and C % tn == 0

    labels2d = labels.astype(jnp.int32).reshape(B, 1)
    kernel = functools.partial(_fused_lmcl_loss_kernel,
                               margin=float(margin), scale=float(scale),
                               tile_n=int(tn))

    need = fixed + tb * per_row
    vmem_limit = int(min(vmem_cap, max(32 * _MiB, need + 16 * _MiB)))

    row_losses = pl.pallas_call(
        kernel,
        out_shape=jax.ShapeDtypeStruct((B, 1), jnp.float32),
        grid_spec=pltpu.PrefetchScalarGridSpec(
            num_scalar_prefetch=0,
            grid=(B // tb, C // tn),
            in_specs=[
                pl.BlockSpec((tb, D), lambda i, j: (i, 0)),   # emb tile
                pl.BlockSpec((tn, D), lambda i, j: (j, 0)),   # centroid tile
                pl.BlockSpec((tb, 1), lambda i, j: (i, 0)),   # labels tile
            ],
            out_specs=pl.BlockSpec((tb, 1), lambda i, j: (i, 0)),
            scratch_shapes=[
                pltpu.VMEM((tb, D), en_dtype),      # normalised emb tile
                pltpu.VMEM((tb, 1), jnp.float32),   # running max
                pltpu.VMEM((tb, 1), jnp.float32),   # running sum-exp
                pltpu.VMEM((tb, 1), jnp.float32),   # target logit
            ]),
        compiler_params=pltpu.CompilerParams(
            # batch tiles are independent -> sharded across v7x's 2 TCs;
            # class axis carries the online-LSE state -> arbitrary.
            dimension_semantics=("parallel", "arbitrary"),
            vmem_limit_bytes=vmem_limit),
    )(emb, centroids, labels2d)
    return jnp.mean(row_losses)


# ----------------------------------------------------------------------------
# Kernel 3: standalone LMCL loss on precomputed cosine logits (no pad copy).
# ----------------------------------------------------------------------------
def _lmcl_loss_kernel(logits_ref, labels_ref, out_ref, *, margin, scale):
    logits = logits_ref[...].astype(jnp.float32)                   # (TB, C)
    labels = labels_ref[...]                                       # (TB, 1)
    col = jax.lax.broadcasted_iota(jnp.int32, logits.shape, 1)
    match = col == labels

    m = jnp.where(match, logits - margin, logits)
    if scale != 1.0:
        m = m * scale

    row_max = jnp.max(m, axis=-1, keepdims=True)
    lse = row_max + jnp.log(jnp.sum(jnp.exp(m - row_max), axis=-1,
                                    keepdims=True))
    tgt = jnp.sum(jnp.where(match, m, 0.0), axis=-1, keepdims=True)
    out_ref[...] = lse - tgt


def lm_cosine_loss(logits, labels, *, margin=MARGIN, scale=SCALE, tile_b=None):
    """logits: [B, C], labels: [B] int. Returns scalar float32 mean loss."""
    B, C = logits.shape
    assert labels.shape == (B,)
    item = jnp.dtype(logits.dtype).itemsize
    work_budget, vmem_cap = _vmem_budget()

    # Full-extent class block (legal even when C % 128 != 0) -> no jnp.pad
    # copy, no in-kernel masking needed.
    per_row = 2 * _lane_pad(C) * item + 2 * _LANE * 4 + 2 * _LANE * 4
    max_rows = max(8, work_budget // per_row)
    min_mult = _min_sublane_mult(logits.dtype)
    req = B if tile_b is None else tile_b
    tb = _sublane_tile(B, req, min_multiple=min_mult, max_rows=max_rows)
    tb = _ensure_min_tiles(B, tb, min_multiple=min_mult)
    assert B % tb == 0

    labels2d = labels.astype(jnp.int32).reshape(B, 1)
    kernel = functools.partial(_lmcl_loss_kernel,
                               margin=float(margin), scale=float(scale))

    need = tb * per_row
    vmem_limit = int(min(vmem_cap, max(32 * _MiB, need + 16 * _MiB)))

    row_losses = pl.pallas_call(
        kernel,
        out_shape=jax.ShapeDtypeStruct((B, 1), jnp.float32),
        grid_spec=pltpu.PrefetchScalarGridSpec(
            num_scalar_prefetch=0,
            grid=(B // tb,),
            in_specs=[
                pl.BlockSpec((tb, C), lambda i: (i, 0)),
                pl.BlockSpec((tb, 1), lambda i: (i, 0)),
            ],
            out_specs=pl.BlockSpec((tb, 1), lambda i: (i, 0)),
        ),
        compiler_params=pltpu.CompilerParams(
            dimension_semantics=("parallel",),   # no cross-step state
            vmem_limit_bytes=vmem_limit),
    )(logits, labels2d)
    return jnp.mean(row_losses)


# ----------------------------------------------------------------------------
# pure-JAX references
# ----------------------------------------------------------------------------
def _forward_ref(emb, centroids):
    en = emb / jnp.linalg.norm(emb, axis=-1, keepdims=True)
    return en @ centroids.T


def _loss_ref(logits, labels, margin=MARGIN, scale=SCALE):
    onehot = jax.nn.one_hot(labels, logits.shape[-1], dtype=jnp.float32)
    m = scale * (logits.astype(jnp.float32) - margin * onehot)
    logz = jax.scipy.special.logsumexp(m, axis=-1)
    tgt = jnp.take_along_axis(m, labels[:, None], axis=-1)[:, 0]
    return jnp.mean(logz - tgt)


if __name__ == "__main__":
    key = jax.random.PRNGKey(0)
    k1, k2, k3 = jax.random.split(key, 3)

    B, D, C = 256, 32, 256          # batch, hidden_dims[-1], num_classes
    emb = jax.random.normal(k1, (B, D), dtype=jnp.float32)
    cent_raw = jax.random.normal(k2, (C, D), dtype=jnp.float32)
    # __init__-time buffer: L2-normalised centroids (kaiming init stand-in).
    centroids = cent_raw / jnp.linalg.norm(cent_raw, axis=-1, keepdims=True)
    labels = jax.random.randint(k3, (B,), 0, C, dtype=jnp.int32)

    ref_logits = _forward_ref(emb, centroids)
    ref_loss = _loss_ref(ref_logits, labels)

    # --- ModelLMCLFixed.forward: (emb, cosine logits), f32 MXU path ---
    emb_out, cos_logits = lmcl_fixed_forward(emb, centroids)
    cos_logits = jax.block_until_ready(cos_logits)
    assert emb_out.shape == emb.shape
    assert jnp.allclose(cos_logits, ref_logits, atol=1e-4, rtol=1e-4), \
        "forward mismatch"

    # Small tiles: exercise the multi-step grid + per-i normalisation reuse.
    _, cos_small = lmcl_fixed_forward(emb, centroids, tile_m=64, tile_n=128)
    cos_small = jax.block_until_ready(cos_small)
    assert jnp.allclose(cos_small, ref_logits, atol=1e-4, rtol=1e-4), \
        "tiled forward mismatch"

    # bf16 MXU inputs (v6e/v7x fast path) -> looser tolerance.
    _, cos_bf16 = lmcl_fixed_forward(emb, centroids, mxu_dtype=jnp.bfloat16)
    cos_bf16 = jax.block_until_ready(cos_bf16)
    assert jnp.allclose(cos_bf16, ref_logits, atol=2e-2, rtol=2e-2), \
        "bf16 forward mismatch"

    # --- Fused train path: normalise + matmul + CosFace CE, no HBM logits ---
    loss_fused = jax.block_until_ready(
        lmcl_fixed_train_loss(emb, centroids, labels))
    assert jnp.allclose(loss_fused, ref_loss, atol=1e-4, rtol=1e-4), \
        (loss_fused, ref_loss)

    # Multi class-tile path (online logsumexp across 2 class tiles).
    loss_fused_mt = jax.block_until_ready(
        lmcl_fixed_train_loss(emb, centroids, labels, tile_b=64, tile_n=128))
    assert jnp.allclose(loss_fused_mt, ref_loss, atol=1e-4, rtol=1e-4), \
        (loss_fused_mt, ref_loss)

    # --- Standalone loss on precomputed cosine logits ---
    loss = jax.block_until_ready(lm_cosine_loss(cos_logits, labels))
    ref_loss_pl = _loss_ref(cos_logits, labels)
    assert jnp.allclose(loss, ref_loss_pl, atol=1e-4, rtol=1e-4), \
        (loss, ref_loss_pl)

    loss_mt = jax.block_until_ready(
        lm_cosine_loss(cos_logits, labels, tile_b=64))
    assert jnp.allclose(loss_mt, ref_loss_pl, atol=1e-4, rtol=1e-4), \
        (loss_mt, ref_loss_pl)

    print("KERNEL_OK")
</pallas_src>

<mosaic_0001>
module attributes {stable_mosaic.version = 11 : i64} {
  func.func @_cosine_logits_kernel(%arg0: i32, %arg1: i32, %arg2: memref<128x32xf32, #tpu.memory_space<vmem>>, %arg3: memref<256x32xf32, #tpu.memory_space<vmem>>, %arg4: memref<128x256xf32, #tpu.memory_space<vmem>>, %arg5: memref<128x32xf32, #tpu.memory_space<vmem>>) attributes {dimension_semantics = [#tpu.dimension_semantics<parallel>, #tpu.dimension_semantics<arbitrary>], iteration_bounds = array<i64: 2, 1>, scalar_prefetch = 0 : i64, scratch_operands = 1 : i64, tpu.core_type = #tpu.core_type<tc>, window_params = [{transform_indices = @transform_0, window_bounds = array<i64: 128, 32>}, {transform_indices = @transform_1, window_bounds = array<i64: 256, 32>}, {transform_indices = @transform_2, window_bounds = array<i64: 128, 256>}]} {
    %c0_i32 = arith.constant 0 : i32
    %0 = arith.cmpi eq, %arg1, %c0_i32 : i32
    %1 = arith.extui %0 : i1 to i32
    %c0_i32_0 = arith.constant 0 : i32
    %2 = arith.cmpi ne, %1, %c0_i32_0 : i32
    scf.if %2 {
      %c0_6 = arith.constant 0 : index
      %c0_7 = arith.constant 0 : index
      %7 = vector.load %arg2[%c0_6, %c0_7] : memref<128x32xf32, #tpu.memory_space<vmem>>, vector<128x32xf32>
      %8 = arith.mulf %7, %7 : vector<128x32xf32>
      %cst_8 = arith.constant dense<0.000000e+00> : vector<128xf32>
      %9 = vector.multi_reduction <add>, %8, %cst_8 [1] : vector<128x32xf32> to vector<128xf32>
      %10 = vector.shape_cast %9 : vector<128xf32> to vector<128x1xf32>
      %11 = math.rsqrt %10 : vector<128x1xf32>
      %12 = vector.broadcast %11 : vector<128x1xf32> to vector<128x32xf32>
      %13 = arith.mulf %7, %12 : vector<128x32xf32>
      %c0_9 = arith.constant 0 : index
      %c0_10 = arith.constant 0 : index
      %14 = vector.load %arg5[%c0_9, %c0_10] : memref<128x32xf32, #tpu.memory_space<vmem>>, vector<128x32xf32>
      tpu.vector_store %arg5[%c0_9, %c0_10], %13 {strides = array<i32>} : memref<128x32xf32, #tpu.memory_space<vmem>>, vector<128x32xf32>,
    } else {
    }
    %c0 = arith.constant 0 : index
    %c0_1 = arith.constant 0 : index
    %3 = vector.load %arg5[%c0, %c0_1] : memref<128x32xf32, #tpu.memory_space<vmem>>, vector<128x32xf32>
    %c0_2 = arith.constant 0 : index
    %c0_3 = arith.constant 0 : index
    %4 = vector.load %arg3[%c0_2, %c0_3] : memref<256x32xf32, #tpu.memory_space<vmem>>, vector<256x32xf32>
    %cst = arith.constant dense<0.000000e+00> : vector<128x256xf32>
    %5 = tpu.matmul %3, %4, %cst {dimension_numbers = #tpu.dot_dimension_numbers<[1], [1], [0], [0], [0, 0, 1, 0], [], []>} : vector<128x32xf32>, vector<256x32xf32>, vector<128x256xf32> -> vector<128x256xf32>
    %c0_4 = arith.constant 0 : index
    %c0_5 = arith.constant 0 : index
    %6 = vector.load %arg4[%c0_4, %c0_5] : memref<128x256xf32, #tpu.memory_space<vmem>>, vector<128x256xf32>
    tpu.vector_store %arg4[%c0_4, %c0_5], %5 {strides = array<i32>} : memref<128x256xf32, #tpu.memory_space<vmem>>, vector<128x256xf32>,
    return
  }
  func.func @transform_0(%arg0: i32, %arg1: i32) -> (i32, i32) {
    %c0_i32 = arith.constant 0 : i32
    %c0_i32_0 = arith.constant 0 : i32
    return %arg0, %c0_i32 : i32, i32
  }
  func.func @transform_1(%arg0: i32, %arg1: i32) -> (i32, i32) {
    %c0_i32 = arith.constant 0 : i32
    %c0_i32_0 = arith.constant 0 : i32
    return %arg1, %c0_i32 : i32, i32
  }
  func.func @transform_2(%arg0: i32, %arg1: i32) -> (i32, i32) {
    %c0_i32 = arith.constant 0 : i32
    return %arg0, %arg1 : i32, i32
  }
}

</mosaic_0001>

<bundles_post_ra>
// kernel: tpu_custom_call.1
= control target key start
LH: loop header
LB: loop body
LE: loop exit
PB: predicated region body
PF: predicated region fallthrough
CT: control target
= control target key end

     0   :  { %7 = vsyncpa [#allocation4], 0  ;;  %s1667_s0 = inlined_call_operand.vmem [shape: f32[256,32], index: 0, kind: input, shape index: {}]   ;;  %s1668_s1 = inlined_call_operand.vmem [shape: f32[256,32], index: 1, kind: input, shape index: {}]   ;;  %s1669_s2 = inlined_call_operand.hbm [shape: f32[256,256], index: 2, kind: output, shape index: {}]  }
   0x1   :  { %9 = vsyncpa [#allocation4 + $0x1], 0  ;;  %s1186_s9 = smov 0   ;;  %s1188_s10 = smov 0  }
   0x2   :  { %s1190_s11 = smov 0   ;;  %s1192_s12 = smov 0  }
   0x3   :  { %s1194_s13 = smov 0   ;;  %s1196_s14 = smov 0  }
   0x4 LB: > { %s806_s15 = sadd.s32 4294967295, %s1166_s14   ;;  %s807_s16 = sadd.s32 4294967294, %s1166_s14   ;;  %s1166_s14 = sphi %s1196_s14, %s15_s14   ;;  %s1162_s13 = sphi %s1194_s13, %s1678_s13   ;;  %s1158_s12 = sphi %s1192_s12, %s1677_s12   ;;  %s1154_s11 = sphi %s1190_s11, %s1676_s11   ;;  %s1150_s10 = sphi %s1188_s10, %s1675_s10   ;;  %s1146_s9 = sphi %s1186_s9, %s1674_s9  }
   0x5   : > { %s27_s17 = sadd.s32 1, %s1162_s13  ;;  %s88_s18 = sadd.s32 1, %s1154_s11 }
   0x6   : > { %p29_p0 = scmp.ge.s32.totalorder %s27_s17, 2  ;;  %p98_p1 = scmp.ne.s32.totalorder %s1154_s11, %s1150_s10 }
   0x7   : > { %p99_p2 = scmp.eq.s32.totalorder %s806_s15, 1  ;;  %p104_p3 = scmp.ne.s32.totalorder %s1150_s10, %s1146_s9 }
   0x8   : > { %s1680_s17 = smov (%p29_p0, %s27_s17), 0  ;;  %p105_p5 = scmp.eq.s32.totalorder %s807_s16, 1 }
   0x9   : > { %p1226_p4 = por %p99_p2, %p98_p1  ;;  %s83_s20 = ssub.s32 %s1162_s13, %s1680_s17 }
   0xa   : > { %p811_p6 = scmp.ge.s32.totalorder %s1166_s14, 1  ;;  %p86_p7 = scmp.eq.s32.totalorder %s83_s20, 0 }
   0xb   : > { %p1233_p8 = por %p105_p5, %p104_p3  ;;  %p141_p9 = scmp.lt.s32.totalorder %s1166_s14, 3 }
   0xc   : > { %s1239_s22 = scalar_select %p86_p7, %s1154_s11, %s88_s18  }
   0xd   : > { %p142_p10 = pnand %p811_p6, %p141_p9 }
   0xe   : > { %s813_s23 = sshll.u32 (!%p142_p10), %s1158_s12, 4  ;;  %vm218_vm0 = vcmask (!%p142_p10), 261120   ;;  %v347_v0 = vld [vmem:[%s1668_s1 + $0x80] sm:$0xff] (!%p142_p10)  ;;  %v348_v1 = vld [vmem:[%s1668_s1 + $0x88] sm:$0xff] (!%p142_p10)  ;;  %v349_v6 = vld [vmem:[%s1668_s1 + $0x90] sm:$0xff] (!%p142_p10)  ;;  %s165_s16 = sand.u32 (!%p142_p10), 1, %s1150_s10  }
   0xf   : > { %145 = sbr.rel (%p142_p10) target bundleno = 453 (0x1c5), region = 28  ;;  %v331_v2 = vld [vmem:[%s1668_s1] sm:$0xff] (!%p142_p10)  ;;  %p169_p11 = scmp.lt.s32.totalorder (!%p142_p10), %s813_s23, 31  ;;  %v935_v3 = vpack.c.bf16 (!%p142_p10), %v348_v1, %v347_v0  ;;  %vm1253_vm1 = vmpackc.low (!%p142_p10), %vm218_vm0, %vm218_vm0  ;;  %v332_v5 = vld [vmem:[%s1668_s1 + $0x8] sm:$0xff] (!%p142_p10) }
  0x10   : > { %v938_v7 = vpack.c.bf16 (!%p142_p10), %v332_v5, %v331_v2  ;;  %v350_v8 = vld [vmem:[%s1668_s1 + $0x98] sm:$0xff] (!%p142_p10)  ;;  %v333_v10 = vld [vmem:[%s1668_s1 + $0x10] sm:$0xff] (!%p142_p10)  ;;  %v351_v12 = vld [vmem:[%s1668_s1 + $0xa0] sm:$0xff] (!%p142_p10)  ;;  %s812_s18 = sshll.u32 (!%p142_p10), %s165_s16, 8  ;;  %s870_s24 = sshll.u32 (!%p142_p10), %s1158_s12, 12 }
  0x11   : > { %937 = vmatprep.subr.msk.bf16.mxu0 (!%p142_p10), %vm1253_vm1, %v935_v3  ;;  %983 = vmatprep.subr.msk.bf16.mxu1 (!%p142_p10), %vm1253_vm1, %v935_v3  ;;  %v941_v9 = vpack.c.bf16 (!%p142_p10), %v350_v8, %v349_v6  ;;  %v334_v11 = vld [vmem:[%s1668_s1 + $0x18] sm:$0xff] (!%p142_p10)  ;;  %v352_v13 = vld [vmem:[%s1668_s1 + $0xa8] sm:$0xff] (!%p142_p10)  ;;  %v335_v32 = vld [vmem:[%s1668_s1 + $0x20] sm:$0xff] (!%p142_p10)  ;;  %s1576_s20 = scalar_lea.vmem (!%p142_p10), [#allocation3], %s812_s18  ;;  %s1613_s28 = scalar_lea.hbm (!%p142_p10), %s1669_s2, %s870_s24 }
  0x12   : > { %940 = vmatpush3.bf16.xpose.msk.msra.mxu0 (!%p142_p10), %vm1253_vm1, %v938_v7  ;;  %991 = vmatpush3.bf16.xpose.msk.msra.mxu1 (!%p142_p10), %vm1253_vm1, %v938_v7  ;;  %v944_v21 = vpack.c.bf16 (!%p142_p10), %v334_v11, %v333_v10  ;;  %v947_v25 = vpack.c.bf16 (!%p142_p10), %v352_v13, %v351_v12  ;;  %v336_v33 = vld [vmem:[%s1668_s1 + $0x28] sm:$0xff] (!%p142_p10)  ;;  %v353_v36 = vld [vmem:[%s1668_s1 + $0xb0] sm:$0xff] (!%p142_p10)  ;;  %v354_v37 = vld [vmem:[%s1668_s1 + $0xb8] sm:$0xff] (!%p142_p10)  ;;  %s718_s25 = sshll.u32 (!%p142_p10), %s1576_s20, 4  ;;  %s1621_s12 = scalar_lea.sflag (!%p142_p10), [#allocation4], %s165_s16  ;;  %s1615_s25 = int_to_ptr.vmem [resolvable:$true] %s718_s25 }
  0x13   : > { %943 = vmatprep.subr.msk.bf16.mxu0 (!%p142_p10), %vm1253_vm1, %v941_v9  ;;  %984 = vmatprep.subr.msk.bf16.mxu1 (!%p142_p10), %vm1253_vm1, %v941_v9  ;;  %v950_v38 = vpack.c.bf16 (!%p142_p10), %v336_v33, %v335_v32  ;;  %v953_v45 = vpack.c.bf16 (!%p142_p10), %v354_v37, %v353_v36  ;;  %v337_v50 = vld [vmem:[%s1668_s1 + $0x30] sm:$0xff] (!%p142_p10)  ;;  %v338_v51 = vld [vmem:[%s1668_s1 + $0x38] sm:$0xff] (!%p142_p10)  ;;  %v355_v54 = vld [vmem:[%s1668_s1 + $0xc0] sm:$0xff] (!%p142_p10)  ;;  %s1088_s29 = scalar_lea.vmem (!%p142_p10), %s1615_s25, 4096  ;;  %s1168_s30 = smov (!%p142_p10), [#allocation3]  }
  0x14   : > { %v356_v55 = vld [vmem:[%s1668_s1 + $0xc8] sm:$0xff] (!%p142_p10)  ;;  %v956_v56 = vpack.c.bf16 (!%p142_p10), %v338_v51, %v337_v50  ;;  %v339_v5 = vld [vmem:[%s1668_s1 + $0x40] sm:$0xff] (!%p142_p10)  ;;  %v357_v9 = vld [vmem:[%s1668_s1 + $0xd0] sm:$0xff] (!%p142_p10)  ;;  %p1089_p12 = scmp.ne.s32.totalorder (!%p142_p10), %s1615_s25, %s1088_s29  ;;  %s1092_s3 = sshll.u32 (!%p142_p10), %s1168_s30, 4  ;;  %s1093_s3 = int_to_ptr.vmem [resolvable:$false] %s1092_s3 }
  0x15   : > { %v959_v63 = vpack.c.bf16 (!%p142_p10), %v356_v55, %v355_v54  ;;  %v340_v6 = vld [vmem:[%s1668_s1 + $0x48] sm:$0xff] (!%p142_p10)  ;;  %v358_v10 = vld [vmem:[%s1668_s1 + $0xd8] sm:$0xff] (!%p142_p10)  ;;  %v361_v33 = vld [vmem:[%s1668_s1 + $0xf0] sm:$0xff] (!%p142_p10)  ;;  %s1094_s4 = scalar_lea.vmem (!%p142_p10), %s1093_s3, 8192  ;;  %p1095_p1 = scmp.lt.s32.totalorder (!%p142_p10), %s1615_s25, %s1093_s3 }
  0x16   : > { %s1682_s23 = smov (!%p169_p11, %s813_s23), 31  ;;  %v962_v11 = vpack.c.bf16 %v340_v6, %v339_v5  ;;  %v344_v32 = vld [vmem:[%s1668_s1 + $0x68] sm:$0xff]  ;;  %v362_v36 = vld [vmem:[%s1668_s1 + $0xf8] sm:$0xff]  ;;  %p1090_p13 = pnand %p1089_p12, %p1226_p4 }
  0x17   : > { %s814_s8 = sshll.u32 %s1682_s23, 3  ;;  %p1096_p2 = scmp.lt.s32.totalorder %s1094_s4, %s1088_s29 }
  0x18   : > { %s1287_s26 = scalar_lea.vmem %s1667_s0, %s814_s8  ;;  %p1091_p0 = pneg %p1090_p13 }
  0x19   : > { %v1296_v14 = vld [vmem:[%s1287_s26] sm:$0xff]  ;;  %v1299_v15 = vld [vmem:[%s1287_s26 + $0x8] sm:$0xff]  ;;  %v1316_v23 = vld [vmem:[%s1287_s26 + $0x10] sm:$0xff]  ;;  %p1097_p3 = por %p1096_p2, %p1095_p1 }
  0x1a   : > { %v1302_v16 = vld [vmem:[%s1287_s26 + $0x40] sm:$0xff]  ;;  %v202_v17 = vmul.f32 %v1296_v14, %v1296_v14  ;;  %v203_v18 = vmul.f32 %v1299_v15, %v1299_v15  ;;  %v1311_v20 = vld [vmem:[%s1287_s26 + $0x48] sm:$0xff]  ;;  %v1319_v24 = vld [vmem:[%s1287_s26 + $0x50] sm:$0xff]  ;;  %v204_v30 = vmul.f32 %v1316_v23, %v1316_v23  ;;  %946 = vmatpush3.bf16.xpose.msk.msra.mxu0 %vm1253_vm1, %v944_v21  ;;  %992 = vmatpush3.bf16.xpose.msk.msra.mxu1 %vm1253_vm1, %v944_v21 }
  0x1b   : > { %v210_v19 = vmul.f32 %v1302_v16, %v1302_v16  ;;  %v211_v22 = vmul.f32 %v1311_v20, %v1311_v20  ;;  %v212_v31 = vmul.f32 %v1319_v24, %v1319_v24  ;;  %v1340_v34 = vld [vmem:[%s1287_s26 + $0x18] sm:$0xff]  ;;  %949 = vmatprep.subr.msk.bf16.mxu0 %vm1253_vm1, %v947_v25  ;;  %985 = vmatprep.subr.msk.bf16.mxu1 %vm1253_vm1, %v947_v25  ;;  %v1362_v43 = vld [vmem:[%s1287_s26 + $0x20] sm:$0xff]  ;;  %v1384_v52 = vld [vmem:[%s1287_s26 + $0x28] sm:$0xff]  ;;  %p1098_p5 = pnand %p1097_p3, %p1091_p0 }
  0x1c   : > { %v219_v26 = vsel %vm218_vm0, %v202_v17, 0.0  ;;  %v222_v27 = vsel %vm218_vm0, %v203_v18, 0.0  ;;  %v1343_v35 = vld [vmem:[%s1287_s26 + $0x58] sm:$0xff]  ;;  %v225_v39 = vsel %vm218_vm0, %v204_v30, 0.0  ;;  %v205_v41 = vmul.f32 %v1340_v34, %v1340_v34  ;;  %v1365_v44 = vld [vmem:[%s1287_s26 + $0x60] sm:$0xff]  ;;  %v1387_v53 = vld [vmem:[%s1287_s26 + $0x68] sm:$0xff] }
  0x1d   : > { %220 = vadd.xlane.f32.xlu0 %v219_v26  ;;  %223 = vadd.xlane.f32.xlu1 %v222_v27  ;;  %v243_v28 = vsel %vm218_vm0, %v210_v19, 0.0  ;;  %v246_v29 = vsel %vm218_vm0, %v211_v22, 0.0  ;;  %v249_v40 = vsel %vm218_vm0, %v212_v31, 0.0  ;;  %v213_v42 = vmul.f32 %v1343_v35, %v1343_v35  ;;  %v1406_v61 = vld [vmem:[%s1287_s26 + $0x30] sm:$0xff]  ;;  %v1428_v7 = vld [vmem:[%s1287_s26 + $0x38] sm:$0xff]  ;;  %v359_v27 = vld [vmem:[%s1668_s1 + $0xe0] sm:$0xff] }
  0x1e   : > { %v228_v46 = vsel %vm218_vm0, %v205_v41, 0.0  ;;  %v206_v48 = vmul.f32 %v1362_v43, %v1362_v43  ;;  %v214_v49 = vmul.f32 %v1365_v44, %v1365_v44  ;;  %v207_v59 = vmul.f32 %v1384_v52, %v1384_v52  ;;  %v1409_v62 = vld [vmem:[%s1287_s26 + $0x70] sm:$0xff]  ;;  %v1431_v8 = vld [vmem:[%s1287_s26 + $0x78] sm:$0xff]  ;;  %v343_v31 = vld [vmem:[%s1668_s1 + $0x60] sm:$0xff] }
  0x1f   : > { %v252_v47 = vsel %vm218_vm0, %v213_v42, 0.0  ;;  %v215_v60 = vmul.f32 %v1387_v53, %v1387_v53  ;;  %v208_v2 = vmul.f32 %v1406_v61, %v1406_v61  ;;  %v216_v3 = vmul.f32 %v1409_v62, %v1409_v62  ;;  %v341_v25 = vld [vmem:[%s1668_s1 + $0x50] sm:$0xff]  ;;  %v342_v26 = vld [vmem:[%s1668_s1 + $0x58] sm:$0xff] }
  0x20   : > { %v231_v57 = vsel %vm218_vm0, %v206_v48, 0.0  ;;  %v255_v58 = vsel %vm218_vm0, %v214_v49, 0.0  ;;  %v234_v0 = vsel %vm218_vm0, %v207_v59, 0.0  ;;  %v209_v17 = vmul.f32 %v1428_v7, %v1428_v7 }
  0x21   : > { %244 = vadd.xlane.f32.xlu0 %v243_v28  ;;  %247 = vadd.xlane.f32.xlu1 %v246_v29  ;;  %v258_v1 = vsel %vm218_vm0, %v215_v60, 0.0  ;;  %v237_v12 = vsel %vm218_vm0, %v208_v2, 0.0  ;;  %v261_v13 = vsel %vm218_vm0, %v216_v3, 0.0  ;;  %v217_v18 = vmul.f32 %v1431_v8, %v1431_v8  ;;  %v360_v28 = vld [vmem:[%s1668_s1 + $0xe8] sm:$0xff] }
  0x22   : > { %952 = vmatpush3.bf16.xpose.msk.msra.mxu0 %vm1253_vm1, %v950_v38  ;;  %993 = vmatpush3.bf16.xpose.msk.msra.mxu1 %vm1253_vm1, %v950_v38  ;;  %v965_v19 = vpack.c.bf16 %v358_v10, %v357_v9  ;;  %v240_v21 = vsel %vm218_vm0, %v209_v17, 0.0  ;;  %v968_v29 = vpack.c.bf16 %v342_v26, %v341_v25  ;;  %v971_v30 = vpack.c.bf16 %v360_v28, %v359_v27 }
  0x23   : > { %955 = vmatprep.subr.msk.bf16.mxu0 %vm1253_vm1, %v953_v45  ;;  %986 = vmatprep.subr.msk.bf16.mxu1 %vm1253_vm1, %v953_v45  ;;  %v264_v22 = vsel %vm218_vm0, %v217_v18, 0.0  ;;  %v974_v37 = vpack.c.bf16 %v344_v32, %v343_v31  ;;  %v977_v38 = vpack.c.bf16 %v362_v36, %v361_v33 }
  0x25   : > { %226 = vadd.xlane.f32.xlu0 %v225_v39  ;;  %250 = vadd.xlane.f32.xlu1 %v249_v40  ;;  %v345_v39 = vld [vmem:[%s1668_s1 + $0x70] sm:$0xff]  ;;  %v346_v40 = vld [vmem:[%s1668_s1 + $0x78] sm:$0xff] }
  0x26   : > { %v980_v41 = vpack.c.bf16 %v346_v40, %v345_v39 }
  0x29   : > { %229 = vadd.xlane.f32.xlu0 %v228_v46  ;;  %253 = vadd.xlane.f32.xlu1 %v252_v47 }
  0x2a   : > { %958 = vmatpush3.bf16.xpose.msk.msra.mxu0 %vm1253_vm1, %v956_v56  ;;  %994 = vmatpush3.bf16.xpose.msk.msra.mxu1 %vm1253_vm1, %v956_v56 }
  0x2b   : > { %961 = vmatprep.subr.msk.bf16.mxu0 %vm1253_vm1, %v959_v63  ;;  %987 = vmatprep.subr.msk.bf16.mxu1 %vm1253_vm1, %v959_v63 }
  0x2d   : > { %232 = vadd.xlane.f32.xlu0 %v231_v57  ;;  %256 = vadd.xlane.f32.xlu1 %v255_v58 }
  0x31   : > { %235 = vadd.xlane.f32.xlu0 %v234_v0  ;;  %259 = vadd.xlane.f32.xlu1 %v258_v1 }
  0x32   : > { %964 = vmatpush3.bf16.xpose.msk.msra.mxu0 %vm1253_vm1, %v962_v11  ;;  %995 = vmatpush3.bf16.xpose.msk.msra.mxu1 %vm1253_vm1, %v962_v11 }
  0x33   : > { %967 = vmatprep.subr.msk.bf16.mxu0 %vm1253_vm1, %v965_v19  ;;  %988 = vmatprep.subr.msk.bf16.mxu1 %vm1253_vm1, %v965_v19 }
  0x35   : > { %238 = vadd.xlane.f32.xlu0 %v237_v12  ;;  %262 = vadd.xlane.f32.xlu1 %v261_v13 }
  0x39   : > { %241 = vadd.xlane.f32.xlu0 %v240_v21  ;;  %265 = vadd.xlane.f32.xlu1 %v264_v22 }
  0x3a   : > { %970 = vmatpush3.bf16.xpose.msk.msra.mxu0 %vm1253_vm1, %v968_v29  ;;  %996 = vmatpush3.bf16.xpose.msk.msra.mxu1 %vm1253_vm1, %v968_v29 }
  0x3b   : > { %973 = vmatprep.subr.msk.bf16.mxu0 %vm1253_vm1, %v971_v30  ;;  %989 = vmatprep.subr.msk.bf16.mxu1 %vm1253_vm1, %v971_v30 }
  0x42   : > { %976 = vmatpush3.bf16.xpose.msk.msra.mxu0 %vm1253_vm1, %v974_v37  ;;  %997 = vmatpush3.bf16.xpose.msk.msra.mxu1 %vm1253_vm1, %v974_v37 }
  0x43   : > { %979 = vmatprep.subr.msk.bf16.mxu0 %vm1253_vm1, %v977_v38  ;;  %990 = vmatprep.subr.msk.bf16.mxu1 %vm1253_vm1, %v977_v38 }
  0x4a   : > { %982 = vmatpush3.bf16.xpose.msk.msra.mxu0 %vm1253_vm1, %v980_v41  ;;  %998 = vmatpush3.bf16.xpose.msk.msra.mxu1 %vm1253_vm1, %v980_v41 }
  0xaa   : > { %v221_v42 = vpop.xlane.xlu0 %220  ;;  %v224_v45 = vpop.xlane.xlu1 %223 }
  0xab   : > { %1056 = vrsqrt.f32 %v221_v42 }
  0xac   : > { %1058 = vrsqrt.f32 %v224_v45 }
  0xae   : > { %v245_v46 = vpop.xlane.xlu0 %244  ;;  %v248_v47 = vpop.xlane.xlu1 %247 }
  0xaf   : > { %1060 = vrsqrt.f32 %v245_v46 }
  0xb0   : > { %1062 = vrsqrt.f32 %v248_v47 }
  0xb2   : > { %v227_v48 = vpop.xlane.xlu0 %226  ;;  %v251_v49 = vpop.xlane.xlu1 %250 }
  0xb3   : > { %1064 = vrsqrt.f32 %v227_v48 }
  0xb4   : > { %1066 = vrsqrt.f32 %v251_v49 }
  0xb5   : > { %v1057_v50 = vpop.eup %1056 }
  0xb6   : > { %v1059_v51 = vpop.eup %1058  ;;  %v283_v54 = vmul.f32 %v1057_v50, %v1296_v14  ;;  %v230_v55 = vpop.xlane.xlu0 %229 }
  0xb7   : > { %v254_v56 = vpop.xlane.xlu1 %253  ;;  %v284_v4 = vmul.f32 %v1059_v51, %v1299_v15  ;;  %1068 = vrsqrt.f32 %v230_v55 }
  0xb8   : > { %299 = vst.msk [vmem:[#allocation2] sm:$0xff] %vm218_vm0, %v283_v54  ;;  %1070 = vrsqrt.f32 %v254_v56 }
  0xb9   : > { %v1061_v57 = vpop.eup %1060  ;;  %300 = vst.msk [vmem:[#allocation2 + $0x8] sm:$0xff] %vm218_vm0, %v284_v4 }
  0xba   : > { %v1063_v58 = vpop.eup %1062  ;;  %v291_v59 = vmul.f32 %v1061_v57, %v1302_v16  ;;  %v233_v60 = vpop.xlane.xlu0 %232 }
  0xbb   : > { %v257_v63 = vpop.xlane.xlu1 %256  ;;  %v292_v0 = vmul.f32 %v1063_v58, %v1311_v20  ;;  %1072 = vrsqrt.f32 %v233_v60 }
  0xbc   : > { %307 = vst.msk [vmem:[#allocation2 + $0x40] sm:$0xff] %vm218_vm0, %v291_v59  ;;  %1074 = vrsqrt.f32 %v257_v63 }
  0xbd   : > { %v1065_v14 = vpop.eup %1064  ;;  %308 = vst.msk [vmem:[#allocation2 + $0x48] sm:$0xff] %vm218_vm0, %v292_v0 }
  0xbe   : > { %v1067_v15 = vpop.eup %1066  ;;  %v285_v1 = vmul.f32 %v1065_v14, %v1316_v23  ;;  %v236_v2 = vpop.xlane.xlu0 %235 }
  0xbf   : > { %v260_v3 = vpop.xlane.xlu1 %259  ;;  %v293_v5 = vmul.f32 %v1067_v15, %v1319_v24  ;;  %v315_v6 = vld [vmem:[#allocation2] sm:$0xff]  ;;  %1076 = vrsqrt.f32 %v236_v2 }
  0xc0   : > { %301 = vst.msk [vmem:[#allocation2 + $0x10] sm:$0xff] %vm218_vm0, %v285_v1  ;;  %903 = vmatprep.mubr.msk.f32.mxu0 %vm218_vm0, %v315_v6  ;;  %1078 = vrsqrt.f32 %v260_v3  ;;  %v316_v16 = vld [vmem:[#allocation2 + $0x8] sm:$0xff] }
  0xc1   : > { %v1069_v20 = vpop.eup %1068  ;;  %309 = vst.msk [vmem:[#allocation2 + $0x50] sm:$0xff] %vm218_vm0, %v293_v5  ;;  %904 = vmatmul.mubr.msk.f32.vlgmr.msra.gmra.mrb[0].mxu0 %vm218_vm0, %v315_v6 }
  0xc2   : > { %v1071_v9 = vpop.eup %1070  ;;  %v286_v23 = vmul.f32 %v1069_v20, %v1340_v34  ;;  %905 = vmatprep.mubr.msk.f32.mxu0 %vm218_vm0, %v316_v16  ;;  %v239_v10 = vpop.xlane.xlu0 %238 }
  0xc3   : > { %v263_v24 = vpop.xlane.xlu1 %262  ;;  %v294_v11 = vmul.f32 %v1071_v9, %v1343_v35  ;;  %v323_v12 = vld [vmem:[#allocation2 + $0x40] sm:$0xff]  ;;  %1080 = vrsqrt.f32 %v239_v10 }
  0xc4   : > { %302 = vst.msk [vmem:[#allocation2 + $0x18] sm:$0xff] %vm218_vm0, %v286_v23  ;;  %919 = vmatprep.mubr.msk.f32.mxu1 %vm218_vm0, %v323_v12  ;;  %1082 = vrsqrt.f32 %v263_v24  ;;  %v324_v13 = vld [vmem:[#allocation2 + $0x48] sm:$0xff] }
  0xc5   : > { %v1073_v17 = vpop.eup %1072  ;;  %310 = vst.msk [vmem:[#allocation2 + $0x58] sm:$0xff] %vm218_vm0, %v294_v11  ;;  %906 = vmatmul.mubr.msk.f32.gmra.mrb[2].mxu0 %vm218_vm0, %v316_v16  ;;  %920 = vmatmul.mubr.msk.f32.vlgmr.msra.gmra.mrb[0].mxu1 %vm218_vm0, %v323_v12 }
  0xc6   : > { %v1075_v34 = vpop.eup %1074  ;;  %v287_v18 = vmul.f32 %v1073_v17, %v1362_v43  ;;  %921 = vmatprep.mubr.msk.f32.mxu1 %vm218_vm0, %v324_v13  ;;  %v242_v35 = vpop.xlane.xlu0 %241 }
  0xc7   : > { %v266_v19 = vpop.xlane.xlu1 %265  ;;  %v295_v21 = vmul.f32 %v1075_v34, %v1365_v44  ;;  %1084 = vrsqrt.f32 %v242_v35  ;;  %v317_v22 = vld [vmem:[#allocation2 + $0x10] sm:$0xff] }
  0xc8   : > { %303 = vst.msk [vmem:[#allocation2 + $0x20] sm:$0xff] %vm218_vm0, %v287_v18  ;;  %1086 = vrsqrt.f32 %v266_v19  ;;  %907 = vmatprep.mubr.msk.f32.mxu0 %vm218_vm0, %v317_v22  ;;  %v325_v25 = vld [vmem:[#allocation2 + $0x50] sm:$0xff] }
  0xc9   : > { %v1077_v26 = vpop.eup %1076  ;;  %311 = vst.msk [vmem:[#allocation2 + $0x60] sm:$0xff] %vm218_vm0, %v295_v21  ;;  %922 = vmatmul.mubr.msk.f32.gmra.mrb[2].mxu1 %vm218_vm0, %v324_v13  ;;  %908 = vmatmul.mubr.msk.f32.gmra.mrb[4].mxu0 %vm218_vm0, %v317_v22 }
  0xca   : > { %v1079_v43 = vpop.eup %1078  ;;  %v288_v27 = vmul.f32 %v1077_v26, %v1384_v52  ;;  %923 = vmatprep.mubr.msk.f32.mxu1 %vm218_vm0, %v325_v25 }
  0xcb   : > { %v296_v44 = vmul.f32 %v1079_v43, %v1387_v53  ;;  %v318_v28 = vld [vmem:[#allocation2 + $0x18] sm:$0xff] }
  0xcc   : > { %304 = vst.msk [vmem:[#allocation2 + $0x28] sm:$0xff] %vm218_vm0, %v288_v27  ;;  %909 = vmatprep.mubr.msk.f32.mxu0 %vm218_vm0, %v318_v28  ;;  %v326_v29 = vld [vmem:[#allocation2 + $0x58] sm:$0xff] }
  0xcd   : > { %v1081_v30 = vpop.eup %1080  ;;  %312 = vst.msk [vmem:[#allocation2 + $0x68] sm:$0xff] %vm218_vm0, %v296_v44  ;;  %924 = vmatmul.mubr.msk.f32.gmra.mrb[4].mxu1 %vm218_vm0, %v325_v25  ;;  %910 = vmatmul.mubr.msk.f32.gmra.mrb[6].mxu0 %vm218_vm0, %v318_v28 }
  0xce   : > { %v1083_v31 = vpop.eup %1082  ;;  %v289_v52 = vmul.f32 %v1081_v30, %v1406_v61  ;;  %925 = vmatprep.mubr.msk.f32.mxu1 %vm218_vm0, %v326_v29 }
  0xcf   : > { %v297_v53 = vmul.f32 %v1083_v31, %v1409_v62  ;;  %v319_v32 = vld [vmem:[#allocation2 + $0x20] sm:$0xff] }
  0xd0   : > { %305 = vst.msk [vmem:[#allocation2 + $0x30] sm:$0xff] %vm218_vm0, %v289_v52  ;;  %911 = vmatprep.mubr.msk.f32.mxu0 %vm218_vm0, %v319_v32  ;;  %v327_v33 = vld [vmem:[#allocation2 + $0x60] sm:$0xff] }
  0xd1   : > { %v1085_v36 = vpop.eup %1084  ;;  %313 = vst.msk [vmem:[#allocation2 + $0x70] sm:$0xff] %vm218_vm0, %v297_v53  ;;  %926 = vmatmul.mubr.msk.f32.gmra.mrb[6].mxu1 %vm218_vm0, %v326_v29  ;;  %912 = vmatmul.mubr.msk.f32.gmra.mrb[8].mxu0 %vm218_vm0, %v319_v32 }
  0xd2   : > { %v1087_v37 = vpop.eup %1086  ;;  %v290_v61 = vmul.f32 %v1085_v36, %v1428_v7  ;;  %927 = vmatprep.mubr.msk.f32.mxu1 %vm218_vm0, %v327_v33 }
  0xd3   : > { %v298_v62 = vmul.f32 %v1087_v37, %v1431_v8  ;;  %v320_v38 = vld [vmem:[#allocation2 + $0x28] sm:$0xff] }
  0xd4   : > { %306 = vst.msk [vmem:[#allocation2 + $0x38] sm:$0xff] %vm218_vm0, %v290_v61  ;;  %913 = vmatprep.mubr.msk.f32.mxu0 %vm218_vm0, %v320_v38  ;;  %v328_v39 = vld [vmem:[#allocation2 + $0x68] sm:$0xff] }
  0xd5   : > { %314 = vst.msk [vmem:[#allocation2 + $0x78] sm:$0xff] %vm218_vm0, %v298_v62  ;;  %928 = vmatmul.mubr.msk.f32.gmra.mrb[8].mxu1 %vm218_vm0, %v327_v33  ;;  %914 = vmatmul.mubr.msk.f32.gmra.mrb[10].mxu0 %vm218_vm0, %v320_v38 }
  0xd6   : > { %929 = vmatprep.mubr.msk.f32.mxu1 %vm218_vm0, %v328_v39 }
  0xd7   : > { %v321_v7 = vld [vmem:[#allocation2 + $0x30] sm:$0xff] }
  0xd8   : > { %915 = vmatprep.mubr.msk.f32.mxu0 %vm218_vm0, %v321_v7  ;;  %v329_v8 = vld [vmem:[#allocation2 + $0x70] sm:$0xff] }
  0xd9   : > { %930 = vmatmul.mubr.msk.f32.gmra.mrb[10].mxu1 %vm218_vm0, %v328_v39  ;;  %916 = vmatmul.mubr.msk.f32.gmra.mrb[12].mxu0 %vm218_vm0, %v321_v7 }
  0xda   : > { %931 = vmatprep.mubr.msk.f32.mxu1 %vm218_vm0, %v329_v8 }
  0xdb   : > { %v322_v40 = vld [vmem:[#allocation2 + $0x38] sm:$0xff] }
  0xdc   : > { %917 = vmatprep.mubr.msk.f32.mxu0 %vm218_vm0, %v322_v40  ;;  %v330_v41 = vld [vmem:[#allocation2 + $0x78] sm:$0xff] }
  0xdd   : > { %932 = vmatmul.mubr.msk.f32.gmra.mrb[12].mxu1 %vm218_vm0, %v329_v8  ;;  %918 = vmatmul.mubr.msk.f32.gmra.mrb[14].mxu0 %vm218_vm0, %v322_v40 }
  0xde   : > { %933 = vmatprep.mubr.msk.f32.mxu1 %vm218_vm0, %v330_v41 }
  0xe1   : > { %934 = vmatmul.mubr.msk.f32.gmra.mrb[14].mxu1 %vm218_vm0, %v330_v41 }
 0x194   : > { %v574_v42 = vpop.f32.mrb[0].mxu0 }
 0x195   : > { %669 = vst [vmem:[%s1576_s20] sm:$0xff] %v574_v42  ;;  %v576_v45 = vpop.f32.mrb[1].mxu0 }
 0x196   : > { %670 = vst [vmem:[%s1576_s20 + $0x8] sm:$0xff] %v576_v45 }
 0x198   : > { %v580_v46 = vpop.f32.mrb[2].mxu0  ;;  %v622_v47 = vpop.f32.mrb[0].mxu1 }
 0x199   : > { %671 = vst [vmem:[%s1576_s20 + $0x10] sm:$0xff] %v580_v46  ;;  %685 = vst [vmem:[%s1576_s20 + $0x80] sm:$0xff] %v622_v47  ;;  %v582_v48 = vpop.f32.mrb[3].mxu0  ;;  %v624_v49 = vpop.f32.mrb[1].mxu1 }
 0x19a   : > { %672 = vst [vmem:[%s1576_s20 + $0x18] sm:$0xff] %v582_v48  ;;  %686 = vst [vmem:[%s1576_s20 + $0x88] sm:$0xff] %v624_v49 }
 0x19c   : > { %v628_v50 = vpop.f32.mrb[2].mxu1  ;;  %v586_v51 = vpop.f32.mrb[4].mxu0 }
 0x19d   : > { %687 = vst [vmem:[%s1576_s20 + $0x90] sm:$0xff] %v628_v50  ;;  %v630_v54 = vpop.f32.mrb[3].mxu1  ;;  %673 = vst [vmem:[%s1576_s20 + $0x20] sm:$0xff] %v586_v51  ;;  %v588_v55 = vpop.f32.mrb[5].mxu0 }
 0x19e   : > { %688 = vst [vmem:[%s1576_s20 + $0x98] sm:$0xff] %v630_v54  ;;  %674 = vst [vmem:[%s1576_s20 + $0x28] sm:$0xff] %v588_v55 }
 0x1a0   : > { %v634_v56 = vpop.f32.mrb[4].mxu1  ;;  %v592_v4 = vpop.f32.mrb[6].mxu0 }
 0x1a1   : > { %689 = vst [vmem:[%s1576_s20 + $0xa0] sm:$0xff] %v634_v56  ;;  %v636_v57 = vpop.f32.mrb[5].mxu1  ;;  %675 = vst [vmem:[%s1576_s20 + $0x30] sm:$0xff] %v592_v4  ;;  %v594_v58 = vpop.f32.mrb[7].mxu0 }
 0x1a2   : > { %690 = vst [vmem:[%s1576_s20 + $0xa8] sm:$0xff] %v636_v57  ;;  %676 = vst [vmem:[%s1576_s20 + $0x38] sm:$0xff] %v594_v58 }
 0x1a4   : > { %v640_v59 = vpop.f32.mrb[6].mxu1  ;;  %v598_v60 = vpop.f32.mrb[8].mxu0 }
 0x1a5   : > { %691 = vst [vmem:[%s1576_s20 + $0xb0] sm:$0xff] %v640_v59  ;;  %v642_v63 = vpop.f32.mrb[7].mxu1  ;;  %677 = vst [vmem:[%s1576_s20 + $0x40] sm:$0xff] %v598_v60  ;;  %v600_v0 = vpop.f32.mrb[9].mxu0 }
 0x1a6   : > { %692 = vst [vmem:[%s1576_s20 + $0xb8] sm:$0xff] %v642_v63  ;;  %678 = vst [vmem:[%s1576_s20 + $0x48] sm:$0xff] %v600_v0 }
 0x1a8   : > { %v646_v14 = vpop.f32.mrb[8].mxu1  ;;  %v604_v15 = vpop.f32.mrb[10].mxu0 }
 0x1a9   : > { %693 = vst [vmem:[%s1576_s20 + $0xc0] sm:$0xff] %v646_v14  ;;  %v648_v1 = vpop.f32.mrb[9].mxu1  ;;  %679 = vst [vmem:[%s1576_s20 + $0x50] sm:$0xff] %v604_v15  ;;  %v606_v2 = vpop.f32.mrb[11].mxu0 }
 0x1aa   : > { %694 = vst [vmem:[%s1576_s20 + $0xc8] sm:$0xff] %v648_v1  ;;  %680 = vst [vmem:[%s1576_s20 + $0x58] sm:$0xff] %v606_v2 }
 0x1ac   : > { %v652_v3 = vpop.f32.mrb[10].mxu1  ;;  %v610_v5 = vpop.f32.mrb[12].mxu0 }
 0x1ad   : > { %695 = vst [vmem:[%s1576_s20 + $0xd0] sm:$0xff] %v652_v3  ;;  %v654_v6 = vpop.f32.mrb[11].mxu1  ;;  %681 = vst [vmem:[%s1576_s20 + $0x60] sm:$0xff] %v610_v5  ;;  %v612_v16 = vpop.f32.mrb[13].mxu0 }
 0x1ae   : > { %696 = vst [vmem:[%s1576_s20 + $0xd8] sm:$0xff] %v654_v6  ;;  %682 = vst [vmem:[%s1576_s20 + $0x68] sm:$0xff] %v612_v16 }
 0x1b0   : > { %v658_v20 = vpop.f32.mrb[12].mxu1  ;;  %v616_v9 = vpop.f32.mrb[14].mxu0 }
 0x1b1   : > { %697 = vst [vmem:[%s1576_s20 + $0xe0] sm:$0xff] %v658_v20  ;;  %v660_v23 = vpop.f32.mrb[13].mxu1  ;;  %683 = vst [vmem:[%s1576_s20 + $0x70] sm:$0xff] %v616_v9  ;;  %v618_v10 = vpop.f32.mrb[15].mxu0 }
 0x1b2   : > { %698 = vst [vmem:[%s1576_s20 + $0xe8] sm:$0xff] %v660_v23  ;;  %684 = vst [vmem:[%s1576_s20 + $0x78] sm:$0xff] %v618_v10 }
 0x1b4   : > { %v664_v24 = vpop.f32.mrb[14].mxu1 }
 0x1b5   : > { %699 = vst [vmem:[%s1576_s20 + $0xf0] sm:$0xff] %v664_v24  ;;  %v666_v11 = vpop.f32.mrb[15].mxu1 }
 0x1b6   : > { %700 = vst [vmem:[%s1576_s20 + $0xf8] sm:$0xff] %v666_v11 }
 0x1b7   : > { %1101 = shalt.err (!%p1098_p5)
}
 0x1b8   : > { %s1102_s5 = scalar_lea.hbm %s1613_s28, 4096  ;;  %s1106_s8 = scalar_lea.hbm %s1669_s2, 8192 }
 0x1b9   : > { %p1103_p6 = scmp.ne.s32.totalorder %s1613_s28, %s1102_s5  ;;  %p1107_p10 = scmp.lt.u32.totalorder %s1613_s28, %s1669_s2 }
 0x1ba   : > { %p1108_p11 = scmp.lt.u32.totalorder %s1106_s8, %s1102_s5  ;;  %p1110_p13 = scmp.lt.u32.totalorder %s1102_s5, %s1613_s28 }
 0x1bb   : > { %p1104_p7 = pnand %p1103_p6, %p1226_p4 }
 0x1bc   : > { %p1109_p12 = por %p1108_p11, %p1107_p10 }
 0x1bd   : > { %p1105_p9 = pneg %p1104_p7 }
 0x1be   : > { %p1111_p0 = por %p1110_p13, %p1109_p12 }
 0x1c0   : > { %p1112_p1 = pnand %p1111_p0, %p1105_p9 }
 0x1c2   : > { %1115 = shalt.err (!%p1112_p1)
}
 0x1c3   : > { %s1169_s16 = smov 256   ;;  %s1170_s18 = smov 16  }
 0x1c4   : > { %999 = dma.vmem_to_hbm [thread:$0]  (%p1226_p4), %s1615_s25, 4096, %s1613_s28, %s1621_s12, %s1169_s16, %s1169_s16, %s1170_s18  }
 0x1c5 PF: > { %p1005_p2 = scmp.ge.s32.totalorder %s1166_s14, 2  ;;  %s733_s20 = sand.u32 1, %s1146_s9  }
 0x1c6   : > { %s734_s24 = scalar_lea.sflag [#allocation4], %s733_s20 }
 0x1c7   : > { %p1002_p3 = pnand %p1005_p2, %p1233_p8 }
 0x1c9   : > { %1141 = dma.done.wait (!%p1002_p3), %s734_s24, 4096  }
 0x1ca   : > { %1143 = vsyncadd (!%p1002_p3), %s734_s24, 4294963200  ;;  %s15_s14 = sadd.s32 1, %s1166_s14   ;;  %s1674_s9 = smov %s1150_s10 }
 0x1cb   : > { %p12_p5 = scmp.ge.s32.totalorder %s15_s14, 4   ;;  %s1675_s10 = smov %s1154_s11 }
 0x1cc   : > { %s1676_s11 = smov %s1239_s22  ;;  %s1677_s12 = smov %s1162_s13 }
 0x1cd   : > { %s1678_s13 = smov %s1680_s17  ;;  %14 = sbr.rel (!%p12_p5) target bundleno = 4 (0x4), region = 70 }
 0x1d4   :  { %739 = vsyncpa [#allocation4], 1 }
 0x1d5   :  { %741 = vsyncpa [#allocation4 + $0x1], 1 }

</bundles_post_ra>
